<compile_context>
chip_gen: v7x
topology: tpu7x:2x2x1
jax: 0.10.0
libtpu: 0.0.40
codegen_flags: <defaults>
</compile_context>

<pallas_src>
import jax
import jax.numpy as jnp
from jax.experimental import pallas as pl
from jax.experimental.pallas import tpu as pltpu


def _round_up(n, m):
    return ((n + m - 1) // m) * m


def _cdiv(a, b):
    return -(-a // b)


# --------------------------------------------------------------------------- kernel


def _make_mlp_kernel(n_hidden, with_dropout, inv_keep):
    """Fused-MLP kernel body for a fixed (static) depth / dropout configuration."""

    def kernel(*refs):
        it = iter(refs)
        x_ref = next(it)
        mask_ref = next(it) if with_dropout else None
        w_in_ref, b_in_ref = next(it), next(it)
        if n_hidden > 0:
            w_hid_ref, b_hid_ref = next(it), next(it)
        w_out_ref, b_out_ref = next(it), next(it)
        o_ref = next(it)

        def layer(h_bf16, w, b, site):
            # bf16 MXU operands, f32 accumulation; bias / dropout / ReLU stay f32.
            y = jnp.dot(h_bf16, w, preferred_element_type=jnp.float32) + b
            if with_dropout:
                keep = mask_ref[site].astype(jnp.float32)
                y = y * (keep * inv_keep)                 # inverted dropout
            return jnp.maximum(y, 0.0).astype(jnp.bfloat16)   # ReLU, bf16 for next MXU pass

        h = layer(x_ref[...], w_in_ref[...], b_in_ref[...], 0)

        # Hidden layers: static unroll (fine for shallow stacks).
        # TODO(synk): switch to lax.fori_loop over w_hid_ref[l] if depth grows past ~8.
        for l in range(n_hidden):
            h = layer(h, w_hid_ref[l], b_hid_ref[l], 1 + l)

        # Output layer (no dropout, no activation).
        o = jnp.dot(h, w_out_ref[...], preferred_element_type=jnp.float32) + b_out_ref[...]
        o_ref[...] = o.astype(o_ref.dtype)

    return kernel


# ------------------------------------------------------------------ parameter prep


def prepare_mlp_params(params):
    """One-time prep: pad feature dims to 128 lanes, cast weights to bf16 / biases to f32.

    Doing this once (outside the step function) removes the per-forward re-pad / re-cast
    HBM traffic the previous version paid on every call.
    """
    w_in, b_in, w_hid, b_hid, w_out, b_out = params
    n_in, width = w_in.shape
    n_out = w_out.shape[1]
    n_hidden = int(w_hid.shape[0])

    K = _round_up(n_in, 128)
    Wp = _round_up(width, 128)
    N = _round_up(n_out, 128)

    f32, bf16 = jnp.float32, jnp.bfloat16
    prepped = {
        "dims": (n_in, width, n_out, n_hidden, K, Wp, N),
        "w_in": jnp.pad(w_in, ((0, K - n_in), (0, Wp - width))).astype(bf16),
        "b_in": jnp.pad(b_in, ((0, 0), (0, Wp - width))).astype(f32),
        "w_out": jnp.pad(w_out, ((0, Wp - width), (0, N - n_out))).astype(bf16),
        "b_out": jnp.pad(b_out, ((0, 0), (0, N - n_out))).astype(f32),
    }
    if n_hidden > 0:
        prepped["w_hid"] = jnp.pad(
            w_hid, ((0, 0), (0, Wp - width), (0, Wp - width))).astype(bf16)
        prepped["b_hid"] = jnp.pad(
            b_hid, ((0, 0), (0, 0), (0, Wp - width))).astype(f32)
    return prepped


def _choose_batch_tiling(B, batch_tile):
    """Batch tiling: <1 tile of padding slack, >=2 tiles when B allows (v7x megacore),
    rows a multiple of 32 (native sublane packing for bf16 x and uint8 masks)."""
    n_tiles = _cdiv(B, max(batch_tile, 32))
    if B >= 64:
        n_tiles = max(n_tiles, 2)
    TB = _round_up(_cdiv(B, n_tiles), 32)
    Bp = _round_up(B, TB)
    return TB, Bp


# ------------------------------------------------------------------------- forward


def mlp_forward(x, prepped, *, keep_mask=None, dropout_p=0.0, batch_tile=256):
    """Fused MLP forward.

    keep_mask: None (eval / train=False) or a (n_hidden+1, batch, mlp_width) array of
      {0,1} keep decisions (bool/uint8).  It is expanded to 0 or 1/(1-dropout_p) in-kernel.
    """
    n_in, width, n_out, n_hidden, K, Wp, N = prepped["dims"]
    B = x.shape[0]
    with_dropout = keep_mask is not None
    n_sites = n_hidden + 1
    inv_keep = 1.0 / (1.0 - float(dropout_p)) if with_dropout else 1.0

    TB, Bp = _choose_batch_tiling(B, batch_tile)
    grid = (Bp // TB,)
    out_dtype = x.dtype

    # Streamed per-call inputs: bf16 activations, uint8 keep-mask.
    xp = jnp.pad(x, ((0, Bp - B), (0, K - n_in))).astype(jnp.bfloat16)
    inputs = [xp]
    in_specs = [pl.BlockSpec((TB, K), lambda i: (i, 0))]
    if with_dropout:
        mp = jnp.pad(keep_mask.astype(jnp.uint8),
                     ((0, 0), (0, Bp - B), (0, Wp - width)))
        inputs.append(mp)
        in_specs.append(pl.BlockSpec((n_sites, TB, Wp), lambda i: (0, i, 0)))

    # Resident weights/biases: constant index_map, single-buffered.
    const2 = lambda i: (0, 0)
    const3 = lambda i: (0, 0, 0)

    def weight_specs(single_buffer):
        def spec(shape, imap):
            if single_buffer:
                return pl.BlockSpec(shape, imap, pipeline_mode=pl.Buffered(1))
            return pl.BlockSpec(shape, imap)

        specs = [spec((K, Wp), const2), spec((1, Wp), const2)]
        if n_hidden > 0:
            specs += [spec((n_hidden, Wp, Wp), const3), spec((n_hidden, 1, Wp), const3)]
        specs += [spec((Wp, N), const2), spec((1, N), const2)]
        return specs

    weights = [prepped["w_in"], prepped["b_in"]]
    if n_hidden > 0:
        weights += [prepped["w_hid"], prepped["b_hid"]]
    weights += [prepped["w_out"], prepped["b_out"]]

    out_spec = pl.BlockSpec((TB, N), lambda i: (i, 0))

    # ---- Honest VMEM budget: weights x1 (single-buffered), streamed tiles x2. ----
    weight_bytes = 2 * (K * Wp + n_hidden * Wp * Wp + Wp * N)            # bf16
    bias_bytes = 4 * (Wp + n_hidden * Wp + N)                            # f32
    stream_bytes = 2 * (TB * K * 2)                                      # bf16 x tiles
    if with_dropout:
        stream_bytes += 2 * (n_sites * TB * Wp)                          # uint8 mask tiles
    out_bytes = 2 * TB * N * jnp.dtype(out_dtype).itemsize
    act_bytes = 2 * TB * Wp * 4                                          # working h headroom
    need = weight_bytes + bias_bytes + stream_bytes + out_bytes + act_bytes

    try:
        vmem_cap = int(pltpu.get_tpu_info().vmem_capacity_bytes)         # 64 MiB v7x, 128 MiB v5e/v6e
    except Exception:
        vmem_cap = 64 * 1024 * 1024
    vmem_budget = int(0.8 * vmem_cap)
    if weight_bytes + bias_bytes > vmem_budget // 2:
        # TODO(synk): tile the output-feature dim or pipeline weights layer-by-layer
        # (pltpu.emit_pipeline / manual make_async_copy) for very wide MLPs.
        raise ValueError(
            f"Resident MLP weights ({(weight_bytes + bias_bytes) / 2**20:.1f} MiB) exceed "
            f"half of the usable VMEM budget ({vmem_budget / 2**20:.1f} MiB).")
    vmem_limit = int(min(vmem_budget, max(16 * 1024 * 1024, int(1.5 * need))))

    flops = 2 * Bp * (K * Wp + n_hidden * Wp * Wp + Wp * N)
    bytes_accessed = (xp.size * 2 + weight_bytes + bias_bytes
                      + Bp * N * jnp.dtype(out_dtype).itemsize
                      + (n_sites * Bp * Wp if with_dropout else 0))
    cost = pl.CostEstimate(flops=flops, transcendentals=0, bytes_accessed=bytes_accessed)

    kernel = _make_mlp_kernel(n_hidden, with_dropout, inv_keep)

    def build(single_buffer_weights):
        return pl.pallas_call(
            kernel,
            out_shape=jax.ShapeDtypeStruct((Bp, N), out_dtype),
            grid_spec=pltpu.PrefetchScalarGridSpec(
                num_scalar_prefetch=0,
                grid=grid,
                in_specs=in_specs + weight_specs(single_buffer_weights),
                out_specs=out_spec,
            ),
            compiler_params=pltpu.CompilerParams(
                dimension_semantics=("parallel",),   # batch tiles shard across v7x's 2 TCs
                vmem_limit_bytes=vmem_limit,
            ),
            cost_estimate=cost,
        )

    args = inputs + weights
    try:
        out = build(True)(*args)
    except Exception:
        # Fallback for Pallas builds that reject single-buffered (Buffered(1)) operands.
        out = build(False)(*args)

    return out[:B, :n_out]


# ----------------------------------------------------------------- init / reference


def init_mlp_params(key, n_inputs, n_outputs, mlp_width, mlp_depth):
    """Deterministic init mimicking nn.Linear's U(-1/sqrt(fan_in), 1/sqrt(fan_in))."""
    n_hidden = mlp_depth - 2
    ks = jax.random.split(key, 2 * (n_hidden + 2))

    def lin(kw, kb, fan_in, fan_out):
        bound = 1.0 / jnp.sqrt(float(fan_in))
        w = jax.random.uniform(kw, (fan_in, fan_out), jnp.float32, -bound, bound)
        b = jax.random.uniform(kb, (1, fan_out), jnp.float32, -bound, bound)
        return w, b

    w_in, b_in = lin(ks[0], ks[1], n_inputs, mlp_width)
    w_hid_l, b_hid_l = [], []
    for i in range(n_hidden):
        w, b = lin(ks[2 + 2 * i], ks[3 + 2 * i], mlp_width, mlp_width)
        w_hid_l.append(w)
        b_hid_l.append(b[None])                     # -> (1, 1, mlp_width)
    if n_hidden > 0:
        w_hid = jnp.stack(w_hid_l, axis=0)          # (n_hidden, W, W)
        b_hid = jnp.concatenate(b_hid_l, axis=0)    # (n_hidden, 1, W)
    else:
        w_hid = jnp.zeros((0, mlp_width, mlp_width), jnp.float32)
        b_hid = jnp.zeros((0, 1, mlp_width), jnp.float32)
    w_out, b_out = lin(ks[-2], ks[-1], mlp_width, n_outputs)
    return (w_in, b_in, w_hid, b_hid, w_out, b_out)


def mlp_reference(x, params, keep_mask=None, dropout_p=0.0):
    """Plain-JAX reference using the same bf16-matmul / f32-accumulate math."""
    w_in, b_in, w_hid, b_hid, w_out, b_out = params
    inv_keep = 1.0 / (1.0 - float(dropout_p)) if keep_mask is not None else 1.0

    def mm(h, w):
        return jnp.dot(h.astype(jnp.bfloat16), w.astype(jnp.bfloat16),
                       preferred_element_type=jnp.float32)

    def site(h, s):
        if keep_mask is not None:
            h = h * (keep_mask[s].astype(jnp.float32) * inv_keep)
        return jnp.maximum(h, 0.0)

    h = site(mm(x, w_in) + b_in, 0)
    for l in range(w_hid.shape[0]):
        h = site(mm(h, w_hid[l]) + b_hid[l], 1 + l)
    return mm(h, w_out) + b_out


# ------------------------------------------------------------------------------ main


if __name__ == "__main__":
    # Shapes consistent with MLP(n_inputs=16, n_outputs=8, mlp_width=32,
    # mlp_depth=4, mlp_dropout=0.1), batch of 8 rows.
    n_inputs, n_outputs, mlp_width, mlp_depth, mlp_dropout = 16, 8, 32, 4, 0.1
    batch = 8

    key = jax.random.PRNGKey(0)
    kx, kp, kd = jax.random.split(key, 3)
    x = jax.random.normal(kx, (batch, n_inputs), jnp.float32)
    params = init_mlp_params(kp, n_inputs, n_outputs, mlp_width, mlp_depth)
    prepped = prepare_mlp_params(params)          # one-time pad + bf16 cast of the weights

    # Eval path (train=False): deterministic, checked against the plain-JAX reference.
    out_eval = mlp_forward(x, prepped)
    jax.block_until_ready(out_eval)
    ref_eval = mlp_reference(x, params)
    assert out_eval.shape == (batch, n_outputs)
    assert jnp.allclose(out_eval, ref_eval, atol=2e-3, rtol=2e-3), "eval mismatch"

    # Train path (train=True): uint8 keep-mask generated host-side, streamed into the
    # kernel, and expanded to inverted-dropout scales in-kernel; checked against the
    # same-mask reference.
    # TODO(synk): dropout bit-stream cannot match torch's RNG; the math is identical.
    n_sites = (mlp_depth - 2) + 1
    keep = jax.random.bernoulli(kd, 1.0 - mlp_dropout,
                                (n_sites, batch, mlp_width)).astype(jnp.uint8)
    out_train = mlp_forward(x, prepped, keep_mask=keep, dropout_p=mlp_dropout)
    jax.block_until_ready(out_train)
    ref_train = mlp_reference(x, params, keep_mask=keep, dropout_p=mlp_dropout)
    assert out_train.shape == (batch, n_outputs)
    assert jnp.allclose(out_train, ref_train, atol=2e-3, rtol=2e-3), "train mismatch"

    print("KERNEL_OK")
</pallas_src>

<mosaic_0001>
module attributes {stable_mosaic.version = 11 : i64} {
  func.func @kernel(%arg0: i32, %arg1: memref<32x128xbf16, #tpu.memory_space<vmem>>, %arg2: memref<128x128xbf16, #tpu.memory_space<vmem>>, %arg3: memref<1x128xf32, #tpu.memory_space<vmem>>, %arg4: memref<2x128x128xbf16, #tpu.memory_space<vmem>>, %arg5: memref<2x1x128xf32, #tpu.memory_space<vmem>>, %arg6: memref<128x128xbf16, #tpu.memory_space<vmem>>, %arg7: memref<1x128xf32, #tpu.memory_space<vmem>>, %arg8: memref<32x128xf32, #tpu.memory_space<vmem>>) attributes {dimension_semantics = [#tpu.dimension_semantics<parallel>], iteration_bounds = array<i64: 1>, scalar_prefetch = 0 : i64, scratch_operands = 0 : i64, tpu.core_type = #tpu.core_type<tc>, window_params = [{transform_indices = @transform_0, window_bounds = array<i64: 32, 128>}, {pipeline_mode = #tpu.pipeline_mode<synchronous>, transform_indices = @transform_1, window_bounds = array<i64: 128, 128>}, {pipeline_mode = #tpu.pipeline_mode<synchronous>, transform_indices = @transform_2, window_bounds = array<i64: 1, 128>}, {pipeline_mode = #tpu.pipeline_mode<synchronous>, transform_indices = @transform_3, window_bounds = array<i64: 2, 128, 128>}, {pipeline_mode = #tpu.pipeline_mode<synchronous>, transform_indices = @transform_4, window_bounds = array<i64: 2, 1, 128>}, {pipeline_mode = #tpu.pipeline_mode<synchronous>, transform_indices = @transform_5, window_bounds = array<i64: 128, 128>}, {pipeline_mode = #tpu.pipeline_mode<synchronous>, transform_indices = @transform_6, window_bounds = array<i64: 1, 128>}, {transform_indices = @transform_7, window_bounds = array<i64: 32, 128>}]} {
    %c0 = arith.constant 0 : index
    %c0_0 = arith.constant 0 : index
    %0 = vector.load %arg1[%c0, %c0_0] : memref<32x128xbf16, #tpu.memory_space<vmem>>, vector<32x128xbf16>
    %c0_1 = arith.constant 0 : index
    %c0_2 = arith.constant 0 : index
    %1 = vector.load %arg2[%c0_1, %c0_2] : memref<128x128xbf16, #tpu.memory_space<vmem>>, vector<128x128xbf16>
    %c0_3 = arith.constant 0 : index
    %c0_4 = arith.constant 0 : index
    %2 = vector.load %arg3[%c0_3, %c0_4] : memref<1x128xf32, #tpu.memory_space<vmem>>, vector<1x128xf32>
    %cst = arith.constant dense<0.000000e+00> : vector<32x128xf32>
    %3 = tpu.matmul %0, %1, %cst {dimension_numbers = #tpu.dot_dimension_numbers<[1], [0], [0], [1], [0, 0, 1, 1], [], []>} : vector<32x128xbf16>, vector<128x128xbf16>, vector<32x128xf32> -> vector<32x128xf32>
    %4 = vector.broadcast %2 : vector<1x128xf32> to vector<32x128xf32>
    %5 = arith.addf %3, %4 : vector<32x128xf32>
    %cst_5 = arith.constant 0.000000e+00 : f32
    %6 = vector.broadcast %cst_5 : f32 to vector<32x128xf32>
    %7 = arith.maximumf %5, %6 : vector<32x128xf32>
    %8 = arith.truncf %7 : vector<32x128xf32> to vector<32x128xbf16>
    %c0_6 = arith.constant 0 : index
    %c0_7 = arith.constant 0 : index
    %c0_8 = arith.constant 0 : index
    %9 = vector.load %arg4[%c0_6, %c0_7, %c0_8] : memref<2x128x128xbf16, #tpu.memory_space<vmem>>, vector<1x128x128xbf16>
    %10 = vector.shape_cast %9 : vector<1x128x128xbf16> to vector<128x128xbf16>
    %c0_9 = arith.constant 0 : index
    %c0_10 = arith.constant 0 : index
    %c0_11 = arith.constant 0 : index
    %11 = vector.load %arg5[%c0_9, %c0_10, %c0_11] : memref<2x1x128xf32, #tpu.memory_space<vmem>>, vector<1x1x128xf32>
    %12 = vector.shape_cast %11 : vector<1x1x128xf32> to vector<1x128xf32>
    %cst_12 = arith.constant dense<0.000000e+00> : vector<32x128xf32>
    %13 = tpu.matmul %8, %10, %cst_12 {dimension_numbers = #tpu.dot_dimension_numbers<[1], [0], [0], [1], [0, 0, 1, 1], [], []>} : vector<32x128xbf16>, vector<128x128xbf16>, vector<32x128xf32> -> vector<32x128xf32>
    %14 = vector.broadcast %12 : vector<1x128xf32> to vector<32x128xf32>
    %15 = arith.addf %13, %14 : vector<32x128xf32>
    %cst_13 = arith.constant 0.000000e+00 : f32
    %16 = vector.broadcast %cst_13 : f32 to vector<32x128xf32>
    %17 = arith.maximumf %15, %16 : vector<32x128xf32>
    %18 = arith.truncf %17 : vector<32x128xf32> to vector<32x128xbf16>
    %c1 = arith.constant 1 : index
    %c0_14 = arith.constant 0 : index
    %c0_15 = arith.constant 0 : index
    %19 = vector.load %arg4[%c1, %c0_14, %c0_15] : memref<2x128x128xbf16, #tpu.memory_space<vmem>>, vector<1x128x128xbf16>
    %20 = vector.shape_cast %19 : vector<1x128x128xbf16> to vector<128x128xbf16>
    %c1_16 = arith.constant 1 : index
    %c0_17 = arith.constant 0 : index
    %c0_18 = arith.constant 0 : index
    %21 = vector.load %arg5[%c1_16, %c0_17, %c0_18] : memref<2x1x128xf32, #tpu.memory_space<vmem>>, vector<1x1x128xf32>
    %22 = vector.shape_cast %21 : vector<1x1x128xf32> to vector<1x128xf32>
    %cst_19 = arith.constant dense<0.000000e+00> : vector<32x128xf32>
    %23 = tpu.matmul %18, %20, %cst_19 {dimension_numbers = #tpu.dot_dimension_numbers<[1], [0], [0], [1], [0, 0, 1, 1], [], []>} : vector<32x128xbf16>, vector<128x128xbf16>, vector<32x128xf32> -> vector<32x128xf32>
    %24 = vector.broadcast %22 : vector<1x128xf32> to vector<32x128xf32>
    %25 = arith.addf %23, %24 : vector<32x128xf32>
    %cst_20 = arith.constant 0.000000e+00 : f32
    %26 = vector.broadcast %cst_20 : f32 to vector<32x128xf32>
    %27 = arith.maximumf %25, %26 : vector<32x128xf32>
    %28 = arith.truncf %27 : vector<32x128xf32> to vector<32x128xbf16>
    %c0_21 = arith.constant 0 : index
    %c0_22 = arith.constant 0 : index
    %29 = vector.load %arg6[%c0_21, %c0_22] : memref<128x128xbf16, #tpu.memory_space<vmem>>, vector<128x128xbf16>
    %cst_23 = arith.constant dense<0.000000e+00> : vector<32x128xf32>
    %30 = tpu.matmul %28, %29, %cst_23 {dimension_numbers = #tpu.dot_dimension_numbers<[1], [0], [0], [1], [0, 0, 1, 1], [], []>} : vector<32x128xbf16>, vector<128x128xbf16>, vector<32x128xf32> -> vector<32x128xf32>
    %c0_24 = arith.constant 0 : index
    %c0_25 = arith.constant 0 : index
    %31 = vector.load %arg7[%c0_24, %c0_25] : memref<1x128xf32, #tpu.memory_space<vmem>>, vector<1x128xf32>
    %32 = vector.broadcast %31 : vector<1x128xf32> to vector<32x128xf32>
    %33 = arith.addf %30, %32 : vector<32x128xf32>
    %c0_26 = arith.constant 0 : index
    %c0_27 = arith.constant 0 : index
    %34 = vector.load %arg8[%c0_26, %c0_27] : memref<32x128xf32, #tpu.memory_space<vmem>>, vector<32x128xf32>
    tpu.vector_store %arg8[%c0_26, %c0_27], %33 {strides = array<i32>} : memref<32x128xf32, #tpu.memory_space<vmem>>, vector<32x128xf32>,
    return
  }
  func.func @transform_0(%arg0: i32) -> (i32, i32) {
    %c0_i32 = arith.constant 0 : i32
    %c0_i32_0 = arith.constant 0 : i32
    return %arg0, %c0_i32 : i32, i32
  }
  func.func @transform_1(%arg0: i32) -> (i32, i32) {
    %c0_i32 = arith.constant 0 : i32
    %c0_i32_0 = arith.constant 0 : i32
    %c0_i32_1 = arith.constant 0 : i32
    return %c0_i32, %c0_i32_0 : i32, i32
  }
  func.func @transform_2(%arg0: i32) -> (i32, i32) {
    %c0_i32 = arith.constant 0 : i32
    %c0_i32_0 = arith.constant 0 : i32
    %c0_i32_1 = arith.constant 0 : i32
    return %c0_i32, %c0_i32_0 : i32, i32
  }
  func.func @transform_3(%arg0: i32) -> (i32, i32, i32) {
    %c0_i32 = arith.constant 0 : i32
    %c0_i32_0 = arith.constant 0 : i32
    %c0_i32_1 = arith.constant 0 : i32
    %c0_i32_2 = arith.constant 0 : i32
    return %c0_i32, %c0_i32_0, %c0_i32_1 : i32, i32, i32
  }
  func.func @transform_4(%arg0: i32) -> (i32, i32, i32) {
    %c0_i32 = arith.constant 0 : i32
    %c0_i32_0 = arith.constant 0 : i32
    %c0_i32_1 = arith.constant 0 : i32
    %c0_i32_2 = arith.constant 0 : i32
    return %c0_i32, %c0_i32_0, %c0_i32_1 : i32, i32, i32
  }
  func.func @transform_5(%arg0: i32) -> (i32, i32) {
    %c0_i32 = arith.constant 0 : i32
    %c0_i32_0 = arith.constant 0 : i32
    %c0_i32_1 = arith.constant 0 : i32
    return %c0_i32, %c0_i32_0 : i32, i32
  }
  func.func @transform_6(%arg0: i32) -> (i32, i32) {
    %c0_i32 = arith.constant 0 : i32
    %c0_i32_0 = arith.constant 0 : i32
    %c0_i32_1 = arith.constant 0 : i32
    return %c0_i32, %c0_i32_0 : i32, i32
  }
  func.func @transform_7(%arg0: i32) -> (i32, i32) {
    %c0_i32 = arith.constant 0 : i32
    %c0_i32_0 = arith.constant 0 : i32
    return %arg0, %c0_i32 : i32, i32
  }
}

module attributes {stable_mosaic.version = 11 : i64} {
  func.func @kernel(%arg0: i32, %arg1: memref<32x128xbf16, #tpu.memory_space<vmem>>, %arg2: memref<128x128xbf16, #tpu.memory_space<vmem>>, %arg3: memref<1x128xf32, #tpu.memory_space<vmem>>, %arg4: memref<2x128x128xbf16, #tpu.memory_space<vmem>>, %arg5: memref<2x1x128xf32, #tpu.memory_space<vmem>>, %arg6: memref<128x128xbf16, #tpu.memory_space<vmem>>, %arg7: memref<1x128xf32, #tpu.memory_space<vmem>>, %arg8: memref<32x128xf32, #tpu.memory_space<vmem>>) attributes {dimension_semantics = [#tpu.dimension_semantics<parallel>], iteration_bounds = array<i64: 1>, scalar_prefetch = 0 : i64, scratch_operands = 0 : i64, tpu.core_type = #tpu.core_type<tc>, window_params = [{transform_indices = @transform_0, window_bounds = array<i64: 32, 128>}, {pipeline_mode = #tpu.pipeline_mode<synchronous>, transform_indices = @transform_1, window_bounds = array<i64: 128, 128>}, {pipeline_mode = #tpu.pipeline_mode<synchronous>, transform_indices = @transform_2, window_bounds = array<i64: 1, 128>}, {pipeline_mode = #tpu.pipeline_mode<synchronous>, transform_indices = @transform_3, window_bounds = array<i64: 2, 128, 128>}, {pipeline_mode = #tpu.pipeline_mode<synchronous>, transform_indices = @transform_4, window_bounds = array<i64: 2, 1, 128>}, {pipeline_mode = #tpu.pipeline_mode<synchronous>, transform_indices = @transform_5, window_bounds = array<i64: 128, 128>}, {pipeline_mode = #tpu.pipeline_mode<synchronous>, transform_indices = @transform_6, window_bounds = array<i64: 1, 128>}, {transform_indices = @transform_7, window_bounds = array<i64: 32, 128>}]} {
    %c0 = arith.constant 0 : index
    %c0_0 = arith.constant 0 : index
    %0 = vector.load %arg1[%c0, %c0_0] : memref<32x128xbf16, #tpu.memory_space<vmem>>, vector<32x128xbf16>
    %c0_1 = arith.constant 0 : index
    %c0_2 = arith.constant 0 : index
    %1 = vector.load %arg2[%c0_1, %c0_2] : memref<128x128xbf16, #tpu.memory_space<vmem>>, vector<128x128xbf16>
    %c0_3 = arith.constant 0 : index
    %c0_4 = arith.constant 0 : index
    %2 = vector.load %arg3[%c0_3, %c0_4] : memref<1x128xf32, #tpu.memory_space<vmem>>, vector<1x128xf32>
    %cst = arith.constant dense<0.000000e+00> : vector<32x128xf32>
    %3 = tpu.matmul %0, %1, %cst {dimension_numbers = #tpu.dot_dimension_numbers<[1], [0], [0], [1], [0, 0, 1, 1], [], []>} : vector<32x128xbf16>, vector<128x128xbf16>, vector<32x128xf32> -> vector<32x128xf32>
    %4 = vector.broadcast %2 : vector<1x128xf32> to vector<32x128xf32>
    %5 = arith.addf %3, %4 : vector<32x128xf32>
    %cst_5 = arith.constant 0.000000e+00 : f32
    %6 = vector.broadcast %cst_5 : f32 to vector<32x128xf32>
    %7 = arith.maximumf %5, %6 : vector<32x128xf32>
    %8 = arith.truncf %7 : vector<32x128xf32> to vector<32x128xbf16>
    %c0_6 = arith.constant 0 : index
    %c0_7 = arith.constant 0 : index
    %c0_8 = arith.constant 0 : index
    %9 = vector.load %arg4[%c0_6, %c0_7, %c0_8] : memref<2x128x128xbf16, #tpu.memory_space<vmem>>, vector<1x128x128xbf16>
    %10 = vector.shape_cast %9 : vector<1x128x128xbf16> to vector<128x128xbf16>
    %c0_9 = arith.constant 0 : index
    %c0_10 = arith.constant 0 : index
    %c0_11 = arith.constant 0 : index
    %11 = vector.load %arg5[%c0_9, %c0_10, %c0_11] : memref<2x1x128xf32, #tpu.memory_space<vmem>>, vector<1x1x128xf32>
    %12 = vector.shape_cast %11 : vector<1x1x128xf32> to vector<1x128xf32>
    %cst_12 = arith.constant dense<0.000000e+00> : vector<32x128xf32>
    %13 = tpu.matmul %8, %10, %cst_12 {dimension_numbers = #tpu.dot_dimension_numbers<[1], [0], [0], [1], [0, 0, 1, 1], [], []>} : vector<32x128xbf16>, vector<128x128xbf16>, vector<32x128xf32> -> vector<32x128xf32>
    %14 = vector.broadcast %12 : vector<1x128xf32> to vector<32x128xf32>
    %15 = arith.addf %13, %14 : vector<32x128xf32>
    %cst_13 = arith.constant 0.000000e+00 : f32
    %16 = vector.broadcast %cst_13 : f32 to vector<32x128xf32>
    %17 = arith.maximumf %15, %16 : vector<32x128xf32>
    %18 = arith.truncf %17 : vector<32x128xf32> to vector<32x128xbf16>
    %c1 = arith.constant 1 : index
    %c0_14 = arith.constant 0 : index
    %c0_15 = arith.constant 0 : index
    %19 = vector.load %arg4[%c1, %c0_14, %c0_15] : memref<2x128x128xbf16, #tpu.memory_space<vmem>>, vector<1x128x128xbf16>
    %20 = vector.shape_cast %19 : vector<1x128x128xbf16> to vector<128x128xbf16>
    %c1_16 = arith.constant 1 : index
    %c0_17 = arith.constant 0 : index
    %c0_18 = arith.constant 0 : index
    %21 = vector.load %arg5[%c1_16, %c0_17, %c0_18] : memref<2x1x128xf32, #tpu.memory_space<vmem>>, vector<1x1x128xf32>
    %22 = vector.shape_cast %21 : vector<1x1x128xf32> to vector<1x128xf32>
    %cst_19 = arith.constant dense<0.000000e+00> : vector<32x128xf32>
    %23 = tpu.matmul %18, %20, %cst_19 {dimension_numbers = #tpu.dot_dimension_numbers<[1], [0], [0], [1], [0, 0, 1, 1], [], []>} : vector<32x128xbf16>, vector<128x128xbf16>, vector<32x128xf32> -> vector<32x128xf32>
    %24 = vector.broadcast %22 : vector<1x128xf32> to vector<32x128xf32>
    %25 = arith.addf %23, %24 : vector<32x128xf32>
    %cst_20 = arith.constant 0.000000e+00 : f32
    %26 = vector.broadcast %cst_20 : f32 to vector<32x128xf32>
    %27 = arith.maximumf %25, %26 : vector<32x128xf32>
    %28 = arith.truncf %27 : vector<32x128xf32> to vector<32x128xbf16>
    %c0_21 = arith.constant 0 : index
    %c0_22 = arith.constant 0 : index
    %29 = vector.load %arg6[%c0_21, %c0_22] : memref<128x128xbf16, #tpu.memory_space<vmem>>, vector<128x128xbf16>
    %cst_23 = arith.constant dense<0.000000e+00> : vector<32x128xf32>
    %30 = tpu.matmul %28, %29, %cst_23 {dimension_numbers = #tpu.dot_dimension_numbers<[1], [0], [0], [1], [0, 0, 1, 1], [], []>} : vector<32x128xbf16>, vector<128x128xbf16>, vector<32x128xf32> -> vector<32x128xf32>
    %c0_24 = arith.constant 0 : index
    %c0_25 = arith.constant 0 : index
    %31 = vector.load %arg7[%c0_24, %c0_25] : memref<1x128xf32, #tpu.memory_space<vmem>>, vector<1x128xf32>
    %32 = vector.broadcast %31 : vector<1x128xf32> to vector<32x128xf32>
    %33 = arith.addf %30, %32 : vector<32x128xf32>
    %c0_26 = arith.constant 0 : index
    %c0_27 = arith.constant 0 : index
    %34 = vector.load %arg8[%c0_26, %c0_27] : memref<32x128xf32, #tpu.memory_space<vmem>>, vector<32x128xf32>
    tpu.vector_store %arg8[%c0_26, %c0_27], %33 {strides = array<i32>} : memref<32x128xf32, #tpu.memory_space<vmem>>, vector<32x128xf32>,
    return
  }
  func.func @transform_0(%arg0: i32) -> (i32, i32) {
    %c0_i32 = arith.constant 0 : i32
    %c0_i32_0 = arith.constant 0 : i32
    return %arg0, %c0_i32 : i32, i32
  }
  func.func @transform_1(%arg0: i32) -> (i32, i32) {
    %c0_i32 = arith.constant 0 : i32
    %c0_i32_0 = arith.constant 0 : i32
    %c0_i32_1 = arith.constant 0 : i32
    return %c0_i32, %c0_i32_0 : i32, i32
  }
  func.func @transform_2(%arg0: i32) -> (i32, i32) {
    %c0_i32 = arith.constant 0 : i32
    %c0_i32_0 = arith.constant 0 : i32
    %c0_i32_1 = arith.constant 0 : i32
    return %c0_i32, %c0_i32_0 : i32, i32
  }
  func.func @transform_3(%arg0: i32) -> (i32, i32, i32) {
    %c0_i32 = arith.constant 0 : i32
    %c0_i32_0 = arith.constant 0 : i32
    %c0_i32_1 = arith.constant 0 : i32
    %c0_i32_2 = arith.constant 0 : i32
    return %c0_i32, %c0_i32_0, %c0_i32_1 : i32, i32, i32
  }
  func.func @transform_4(%arg0: i32) -> (i32, i32, i32) {
    %c0_i32 = arith.constant 0 : i32
    %c0_i32_0 = arith.constant 0 : i32
    %c0_i32_1 = arith.constant 0 : i32
    %c0_i32_2 = arith.constant 0 : i32
    return %c0_i32, %c0_i32_0, %c0_i32_1 : i32, i32, i32
  }
  func.func @transform_5(%arg0: i32) -> (i32, i32) {
    %c0_i32 = arith.constant 0 : i32
    %c0_i32_0 = arith.constant 0 : i32
    %c0_i32_1 = arith.constant 0 : i32
    return %c0_i32, %c0_i32_0 : i32, i32
  }
  func.func @transform_6(%arg0: i32) -> (i32, i32) {
    %c0_i32 = arith.constant 0 : i32
    %c0_i32_0 = arith.constant 0 : i32
    %c0_i32_1 = arith.constant 0 : i32
    return %c0_i32, %c0_i32_0 : i32, i32
  }
  func.func @transform_7(%arg0: i32) -> (i32, i32) {
    %c0_i32 = arith.constant 0 : i32
    %c0_i32_0 = arith.constant 0 : i32
    return %arg0, %c0_i32 : i32, i32
  }
}

</mosaic_0001>

<bundles_post_ra>
// kernel: tpu_custom_call.1
= control target key start
LH: loop header
LB: loop body
LE: loop exit
PB: predicated region body
PF: predicated region fallthrough
CT: control target
= control target key end

     0   :  { %12 = vsyncpa [#allocation3], 0  ;;  %s1089_s0 = inlined_call_operand.hbm [shape: bf16[32,128], index: 0, kind: input, shape index: {}]   ;;  %s1090_s1 = inlined_call_operand.hbm [shape: bf16[128,128], index: 1, kind: input, shape index: {}]   ;;  %s1091_s2 = inlined_call_operand.vmem [shape: f32[1,128], index: 2, kind: input, shape index: {}]   ;;  %s1092_s3 = inlined_call_operand.hbm [shape: bf16[2,128,128], index: 3, kind: input, shape index: {}]   ;;  %s1093_s4 = inlined_call_operand.vmem [shape: f32[2,1,128], index: 4, kind: input, shape index: {}]   ;;  %s1094_s5 = inlined_call_operand.hbm [shape: bf16[128,128], index: 5, kind: input, shape index: {}]   ;;  %s1095_s6 = inlined_call_operand.vmem [shape: f32[1,128], index: 6, kind: input, shape index: {}]   ;;  %s1096_s7 = inlined_call_operand.hbm [shape: f32[32,128], index: 7, kind: output, shape index: {}]  }
   0x1   :  { %13 = vsyncpa [#allocation6], 0 }
   0x2   :  { %14 = vsyncpa [#allocation9], 0 }
   0x3   :  { %15 = vsyncpa [#allocation4], 0  ;;  %s942_s24 = smov [#allocation5]   ;;  %s943_s26 = smov [#allocation2]  }
   0x4   :  { %s33_s25 = sshll.u32 %s942_s24, 4  ;;  %s21_s27 = sshll.u32 %s943_s26, 4  ;;  %s34_s25 = int_to_ptr.vmem [resolvable:$true] %s33_s25  ;;  %s991_s27 = int_to_ptr.vmem [resolvable:$true] %s21_s27 }
   0x5   :  { %s824_s30 = scalar_lea.hbm %s1090_s1, 1024 }
   0x6   :  { %p825_p0 = scmp.ne.s32.totalorder %s1090_s1, %s824_s30  ;;  %p828_p1 = scmp.lt.u32.totalorder %s824_s30, %s1090_s1 }
   0x8   :  { %p830_p2 = pnand %p828_p1, %p825_p0 }
   0xa   :  { %833 = shalt.err (!%p830_p2)
}
   0xb   :  { %s834_s12 = scalar_lea.vmem %s34_s25, 1024  ;;  %p839_p4 = scmp.lt.s32.totalorder %s34_s25, %s34_s25 }
   0xc   :  { %p835_p3 = scmp.ne.s32.totalorder %s34_s25, %s834_s12  ;;  %p840_p5 = scmp.lt.s32.totalorder %s834_s12, %s834_s12 }
   0xe   :  { %p841_p6 = por %p840_p5, %p839_p4 }
  0x10   :  { %p842_p7 = pnand %p841_p6, %p835_p3 }
  0x12   :  { %845 = shalt.err (!%p842_p7)
}
  0x13   :  { %s944_s13 = smov 64   ;;  %s945_s14 = smov 4  }
  0x14   :  { %39 = dma.hbm_to_vmem [thread:$0]  %s1090_s1, 1024, %s34_s25, [#allocation6], %s944_s13, %s944_s13, %s945_s14  }
  0x15   :  { %s846_s19 = scalar_lea.hbm %s1089_s0, 256 }
  0x16   :  { %p847_p8 = scmp.ne.s32.totalorder %s1089_s0, %s846_s19  ;;  %p850_p9 = scmp.lt.u32.totalorder %s846_s19, %s1089_s0 }
  0x18   :  { %p852_p10 = pnand %p850_p9, %p847_p8 }
  0x1a   :  { %855 = shalt.err (!%p852_p10)
}
  0x1b   :  { %s856_s24 = scalar_lea.vmem %s991_s27, 256  ;;  %p861_p12 = scmp.lt.s32.totalorder %s991_s27, %s991_s27 }
  0x1c   :  { %p857_p11 = scmp.ne.s32.totalorder %s991_s27, %s856_s24  ;;  %p862_p13 = scmp.lt.s32.totalorder %s856_s24, %s856_s24 }
  0x1e   :  { %p863_p0 = por %p862_p13, %p861_p12 }
  0x20   :  { %p864_p1 = pnand %p863_p0, %p857_p11 }
  0x22   :  { %867 = shalt.err (!%p864_p1)
}
  0x23   :  { %27 = dma.hbm_to_vmem [thread:$0]  %s1089_s0, 256, %s991_s27, [#allocation3], %s944_s13, %s944_s13, %s945_s14  }
  0x24   :  { %s946_s26 = smov [#allocation7]   ;;  %s947_s29 = smov [#allocation8]  }
  0x25   :  { %s47_s28 = sshll.u32 %s946_s26, 4  ;;  %s61_s30 = sshll.u32 %s947_s29, 4  ;;  %s48_s28 = int_to_ptr.vmem [resolvable:$true] %s47_s28  ;;  %s1028_s30 = int_to_ptr.vmem [resolvable:$true] %s61_s30 }
  0x26   :  { %s868_s10 = scalar_lea.hbm %s1092_s3, 2048 }
  0x27   :  { %p869_p2 = scmp.ne.s32.totalorder %s1092_s3, %s868_s10  ;;  %p872_p3 = scmp.lt.u32.totalorder %s868_s10, %s1092_s3 }
  0x29   :  { %p874_p4 = pnand %p872_p3, %p869_p2 }
  0x2b   :  { %877 = shalt.err (!%p874_p4)
}
  0x2c   :  { %s878_s0 = scalar_lea.vmem %s48_s28, 2048  ;;  %p883_p6 = scmp.lt.s32.totalorder %s48_s28, %s48_s28 }
  0x2d   :  { %p879_p5 = scmp.ne.s32.totalorder %s48_s28, %s878_s0  ;;  %p884_p7 = scmp.lt.s32.totalorder %s878_s0, %s878_s0 }
  0x2f   :  { %p885_p8 = por %p884_p7, %p883_p6 }
  0x31   :  { %p886_p9 = pnand %p885_p8, %p879_p5 }
  0x33   :  { %889 = shalt.err (!%p886_p9)
}
  0x34   :  { %53 = dma.hbm_to_vmem [thread:$0]  %s1092_s3, 2048, %s48_s28, [#allocation6], %s944_s13, %s944_s13, %s945_s14  }
  0x35   :  { %s890_s20 = scalar_lea.hbm %s1094_s5, 1024 }
  0x36   :  { %p891_p10 = scmp.ne.s32.totalorder %s1094_s5, %s890_s20  ;;  %p894_p11 = scmp.lt.u32.totalorder %s890_s20, %s1094_s5 }
  0x38   :  { %p896_p12 = pnand %p894_p11, %p891_p10 }
  0x3a   :  { %899 = shalt.err (!%p896_p12)
}
  0x3b   :  { %s900_s1 = scalar_lea.vmem %s1028_s30, 1024  ;;  %p905_p0 = scmp.lt.s32.totalorder %s1028_s30, %s1028_s30 }
  0x3c   :  { %p901_p13 = scmp.ne.s32.totalorder %s1028_s30, %s900_s1  ;;  %p906_p1 = scmp.lt.s32.totalorder %s900_s1, %s900_s1 }
  0x3e   :  { %p907_p2 = por %p906_p1, %p905_p0 }
  0x40   :  { %p908_p3 = pnand %p907_p2, %p901_p13 }
  0x42   :  { %911 = shalt.err (!%p908_p3)
}
  0x43   :  { %67 = dma.hbm_to_vmem [thread:$0]  %s1094_s5, 1024, %s1028_s30, [#allocation9], %s944_s13, %s944_s13, %s945_s14  }
  0x44   :  { %934 = dma.done.wait [#allocation3], 256  }
  0x45   :  { %935 = vsyncadd [#allocation3], 4294967040 }
  0x46   :  { %936 = dma.done.wait [#allocation6], 3072  }
  0x47   :  { %937 = vsyncadd [#allocation6], 4294964224 }
  0x48   :  { %938 = dma.done.wait [#allocation9], 1024  }
  0x49   :  { %939 = vsyncadd [#allocation9], 4294966272  ;;  %v790_v0 = vld [vmem:[#allocation5] sm:$0xff]   ;;  %v791_v1 = vld [vmem:[#allocation5 + $0x8] sm:$0xff]  }
  0x4a   :  { %701 = vmatprep.subr.bf16.mxu0 %v790_v0  ;;  %v792_v2 = vld [vmem:[#allocation5 + $0x10] sm:$0xff]   ;;  %v793_v3 = vld [vmem:[#allocation5 + $0x18] sm:$0xff]   ;;  %v800_v5 = vld [vmem:[#allocation7] sm:$0xff]  }
  0x4b   :  { %702 = vmatpush3.bf16.msra.mxu0 %v790_v0  ;;  %v798_v4 = vld [vmem:[#allocation2] sm:$0xff]   ;;  %v801_v6 = vld [vmem:[#allocation7 + $0x8] sm:$0xff]   ;;  %v794_v7 = vld [vmem:[#allocation5 + $0x20] sm:$0xff]   ;;  %721 = vmatprep.subr.bf16.mxu1 %v800_v5 }
  0x4c   :  { %703 = vmatprep.subr.bf16.mxu0 %v791_v1  ;;  %717 = vmatprep.mubr.bf16.mxu0 %v798_v4  ;;  %v802_v8 = vld [vmem:[#allocation7 + $0x10] sm:$0xff]   ;;  %v795_v9 = vld [vmem:[#allocation5 + $0x28] sm:$0xff]   ;;  %v803_v10 = vld [vmem:[#allocation7 + $0x18] sm:$0xff]  }
  0x4d   :  { %722 = vmatpush3.bf16.msra.mxu1 %v800_v5  ;;  %v796_v11 = vld [vmem:[#allocation5 + $0x30] sm:$0xff]   ;;  %v804_v12 = vld [vmem:[#allocation7 + $0x20] sm:$0xff]   ;;  %v797_v13 = vld [vmem:[#allocation5 + $0x38] sm:$0xff]  }
  0x4e   :  { %723 = vmatprep.subr.bf16.mxu1 %v801_v6  ;;  %v805_v14 = vld [vmem:[#allocation7 + $0x28] sm:$0xff]   ;;  %v799_v15 = vld [vmem:[#allocation2 + $0x8] sm:$0xff]   ;;  %v806_v16 = vld [vmem:[#allocation7 + $0x30] sm:$0xff]  }
  0x4f   :  { %704 = vmatpush3.bf16.msra.mxu0 %v791_v1  ;;  %v807_v17 = vld [vmem:[#allocation7 + $0x38] sm:$0xff]   ;;  %v808_v18 = vld [vmem:[#allocation7 + $0x40] sm:$0xff]   ;;  %v809_v19 = vld [vmem:[#allocation7 + $0x48] sm:$0xff]  }
  0x50   :  { %705 = vmatprep.subr.bf16.mxu0 %v792_v2  ;;  %v810_v20 = vld [vmem:[#allocation7 + $0x50] sm:$0xff]   ;;  %v811_v21 = vld [vmem:[#allocation7 + $0x58] sm:$0xff]   ;;  %v812_v22 = vld [vmem:[#allocation7 + $0x60] sm:$0xff]  }
  0x51   :  { %724 = vmatpush3.bf16.msra.mxu1 %v801_v6  ;;  %v813_v23 = vld [vmem:[#allocation7 + $0x68] sm:$0xff]   ;;  %v622_v24 = vld [vmem:[%s1091_s2] ss:$0 sm:$0xff]  ;;  %v815_v40 = vld [vmem:[#allocation7 + $0x78] sm:$0xff]  }
  0x52   :  { %725 = vmatprep.subr.bf16.mxu1 %v802_v8  ;;  %v814_v39 = vld [vmem:[#allocation7 + $0x70] sm:$0xff]   ;;  %v816_v41 = vld [vmem:[#allocation8] sm:$0xff]   ;;  %v817_v42 = vld [vmem:[#allocation8 + $0x8] sm:$0xff]  }
  0x53   :  { %706 = vmatpush3.bf16.msra.mxu0 %v792_v2  ;;  %v818_v43 = vld [vmem:[#allocation8 + $0x10] sm:$0xff]   ;;  %v819_v44 = vld [vmem:[#allocation8 + $0x18] sm:$0xff]   ;;  %v820_v45 = vld [vmem:[#allocation8 + $0x20] sm:$0xff]  }
  0x54   :  { %707 = vmatprep.subr.bf16.mxu0 %v793_v3  ;;  %v821_v46 = vld [vmem:[#allocation8 + $0x28] sm:$0xff]   ;;  %v633_v47 = vld [vmem:[%s1093_s4] ss:$0 sm:$0xff]  ;;  %v823_v63 = vld [vmem:[#allocation8 + $0x38] sm:$0xff]  }
  0x55   :  { %726 = vmatpush3.bf16.msra.mxu1 %v802_v8  ;;  %v822_v62 = vld [vmem:[#allocation8 + $0x30] sm:$0xff]  }
  0x56   :  { %727 = vmatprep.subr.bf16.mxu1 %v803_v10  ;;  %v643_v0 = vld [vmem:[%s1093_s4 + $0x1] ss:$0 sm:$0xff]  ;;  %s948_s4 = smov [#allocation10]  }
  0x57   :  { %708 = vmatpush3.bf16.msra.mxu0 %v793_v3  ;;  %s608_s8 = sshll.u32 %s948_s4, 4  ;;  %s609_s8 = int_to_ptr.vmem [resolvable:$true] %s608_s8 }
  0x58   :  { %709 = vmatprep.subr.bf16.mxu0 %v794_v7  ;;  %s912_s9 = scalar_lea.vmem %s609_s8, 512  ;;  %p917_p5 = scmp.lt.s32.totalorder %s609_s8, %s609_s8 }
  0x59   :  { %728 = vmatpush3.bf16.msra.mxu1 %v803_v10  ;;  %p913_p4 = scmp.ne.s32.totalorder %s609_s8, %s912_s9  ;;  %p918_p6 = scmp.lt.s32.totalorder %s912_s9, %s912_s9 }
  0x5a   :  { %729 = vmatprep.subr.bf16.mxu1 %v804_v12 }
  0x5b   :  { %710 = vmatpush3.bf16.msra.mxu0 %v794_v7  ;;  %p919_p7 = por %p918_p6, %p917_p5 }
  0x5c   :  { %711 = vmatprep.subr.bf16.mxu0 %v795_v9 }
  0x5d   :  { %730 = vmatpush3.bf16.msra.mxu1 %v804_v12  ;;  %p920_p8 = pnand %p919_p7, %p913_p4 }
  0x5e   :  { %731 = vmatprep.subr.bf16.mxu1 %v805_v14 }
  0x5f   :  { %712 = vmatpush3.bf16.msra.mxu0 %v795_v9 }
  0x60   :  { %713 = vmatprep.subr.bf16.mxu0 %v796_v11 }
  0x61   :  { %732 = vmatpush3.bf16.msra.mxu1 %v805_v14 }
  0x62   :  { %733 = vmatprep.subr.bf16.mxu1 %v806_v16 }
  0x63   :  { %714 = vmatpush3.bf16.msra.mxu0 %v796_v11 }
  0x64   :  { %715 = vmatprep.subr.bf16.mxu0 %v797_v13 }
  0x65   :  { %734 = vmatpush3.bf16.msra.mxu1 %v806_v16 }
  0x66   :  { %735 = vmatprep.subr.bf16.mxu1 %v807_v17 }
  0x67   :  { %716 = vmatpush3.bf16.msra.mxu0 %v797_v13 }
  0x68   :  { %741 = vmatprep.subr.bf16.mxu0 %v808_v18 }
  0x69   :  { %736 = vmatpush3.bf16.msra.mxu1 %v807_v17 }
  0x6a   :  { %718 = vmatmul.mubr.bf16.vlgmr.msra.gmra.mrb[0].mxu0 %v799_v15  ;;  %761 = vmatprep.subr.bf16.mxu1 %v816_v41  ;;  %v652_v15 = vld [vmem:[%s1095_s6] ss:$0 sm:$0xff] }
  0x6b   :  { %742 = vmatpush3.bf16.msra.mxu0 %v808_v18 }
  0x6c   :  { %743 = vmatprep.subr.bf16.mxu0 %v809_v19 }
  0x6f   :  { %744 = vmatpush3.bf16.msra.mxu0 %v809_v19 }
  0x70   :  { %745 = vmatprep.subr.bf16.mxu0 %v810_v20 }
  0x73   :  { %746 = vmatpush3.bf16.msra.mxu0 %v810_v20 }
  0x74   :  { %747 = vmatprep.subr.bf16.mxu0 %v811_v21 }
  0x77   :  { %748 = vmatpush3.bf16.msra.mxu0 %v811_v21 }
  0x78   :  { %749 = vmatprep.subr.bf16.mxu0 %v812_v22 }
  0x7b   :  { %750 = vmatpush3.bf16.msra.mxu0 %v812_v22 }
  0x7c   :  { %751 = vmatprep.subr.bf16.mxu0 %v813_v23 }
  0x7f   :  { %752 = vmatpush3.bf16.msra.mxu0 %v813_v23 }
  0x80   :  { %753 = vmatprep.subr.bf16.mxu0 %v814_v39 }
  0x83   :  { %754 = vmatpush3.bf16.msra.mxu0 %v814_v39 }
  0x84   :  { %755 = vmatprep.subr.bf16.mxu0 %v815_v40 }
  0x87   :  { %756 = vmatpush3.bf16.msra.mxu0 %v815_v40 }
 0x13d   :  { %v719_v25 = vpop.f32.mrb[0].mxu0 }
 0x13e   :  { %v213_v26 = vadd.f32 %v719_v25, %v622_v24  ;;  %v204_v27 = vpop.f32.mrb[1].mxu0 }
 0x13f   :  { %v205_v28 = vadd.f32 %v622_v24, %v204_v27  ;;  %v720_v29 = vpop.f32.mrb[2].mxu0 }
 0x140   :  { %v216_v30 = vadd.f32 %v720_v29, %v622_v24  ;;  %v207_v31 = vpop.f32.mrb[3].mxu0  ;;  %v221_v33 = vmax.f32 %v213_v26, 0.0 }
 0x141   :  { %v208_v32 = vadd.f32 %v622_v24, %v207_v31  ;;  %v219_v35 = vmax.f32 %v205_v28, 0.0 }
 0x142   :  { %v222_v34 = vmax.f32 %v216_v30, 0.0 }
 0x143   :  { %v220_v36 = vmax.f32 %v208_v32, 0.0 }
 0x144   :  { %v224_v37 = vpack.c.bf16 %v222_v34, %v221_v33 }
 0x145   :  { %v223_v38 = vpack.c.bf16 %v220_v36, %v219_v35 }
 0x147   :  { %737 = vmatprep.mubr.bf16.mxu1 %v223_v38 }
 0x148   :  { %738 = vmatmul.mubr.bf16.vlgmr.msra.gmra.mrb[0].mxu1 %v224_v37 }
 0x149   :  { %762 = vmatpush3.bf16.msra.mxu1 %v816_v41 }
 0x14a   :  { %763 = vmatprep.subr.bf16.mxu1 %v817_v42 }
 0x14d   :  { %764 = vmatpush3.bf16.msra.mxu1 %v817_v42 }
 0x14e   :  { %765 = vmatprep.subr.bf16.mxu1 %v818_v43 }
 0x151   :  { %766 = vmatpush3.bf16.msra.mxu1 %v818_v43 }
 0x152   :  { %767 = vmatprep.subr.bf16.mxu1 %v819_v44 }
 0x155   :  { %768 = vmatpush3.bf16.msra.mxu1 %v819_v44 }
 0x156   :  { %769 = vmatprep.subr.bf16.mxu1 %v820_v45 }
 0x159   :  { %770 = vmatpush3.bf16.msra.mxu1 %v820_v45 }
 0x15a   :  { %771 = vmatprep.subr.bf16.mxu1 %v821_v46 }
 0x15d   :  { %772 = vmatpush3.bf16.msra.mxu1 %v821_v46 }
 0x15e   :  { %773 = vmatprep.subr.bf16.mxu1 %v822_v62 }
 0x161   :  { %774 = vmatpush3.bf16.msra.mxu1 %v822_v62 }
 0x162   :  { %775 = vmatprep.subr.bf16.mxu1 %v823_v63 }
 0x165   :  { %776 = vmatpush3.bf16.msra.mxu1 %v823_v63 }
 0x21b   :  { %v739_v48 = vpop.f32.mrb[0].mxu1 }
 0x21c   :  { %v339_v49 = vadd.f32 %v739_v48, %v633_v47  ;;  %v330_v50 = vpop.f32.mrb[1].mxu1 }
 0x21d   :  { %v331_v51 = vadd.f32 %v633_v47, %v330_v50  ;;  %v740_v52 = vpop.f32.mrb[2].mxu1 }
 0x21e   :  { %v342_v53 = vadd.f32 %v740_v52, %v633_v47  ;;  %v333_v54 = vpop.f32.mrb[3].mxu1  ;;  %v347_v56 = vmax.f32 %v339_v49, 0.0 }
 0x21f   :  { %v334_v55 = vadd.f32 %v633_v47, %v333_v54  ;;  %v345_v58 = vmax.f32 %v331_v51, 0.0 }
 0x220   :  { %v348_v57 = vmax.f32 %v342_v53, 0.0 }
 0x221   :  { %v346_v59 = vmax.f32 %v334_v55, 0.0 }
 0x222   :  { %v350_v60 = vpack.c.bf16 %v348_v57, %v347_v56 }
 0x223   :  { %v349_v61 = vpack.c.bf16 %v346_v59, %v345_v58 }
 0x225   :  { %757 = vmatprep.mubr.bf16.mxu0 %v349_v61 }
 0x226   :  { %758 = vmatmul.mubr.bf16.vlgmr.msra.gmra.mrb[4].mxu0 %v350_v60 }
 0x2f9   :  { %v759_v1 = vpop.f32.mrb[4].mxu0 }
 0x2fa   :  { %v467_v2 = vadd.f32 %v759_v1, %v643_v0  ;;  %v458_v3 = vpop.f32.mrb[5].mxu0 }
 0x2fb   :  { %v459_v4 = vadd.f32 %v643_v0, %v458_v3  ;;  %v760_v5 = vpop.f32.mrb[6].mxu0 }
 0x2fc   :  { %v470_v6 = vadd.f32 %v760_v5, %v643_v0  ;;  %v461_v7 = vpop.f32.mrb[7].mxu0  ;;  %v475_v9 = vmax.f32 %v467_v2, 0.0 }
 0x2fd   :  { %v462_v8 = vadd.f32 %v643_v0, %v461_v7  ;;  %v473_v11 = vmax.f32 %v459_v4, 0.0 }
 0x2fe   :  { %v476_v10 = vmax.f32 %v470_v6, 0.0 }
 0x2ff   :  { %v474_v12 = vmax.f32 %v462_v8, 0.0 }
 0x300   :  { %v478_v13 = vpack.c.bf16 %v476_v10, %v475_v9 }
 0x301   :  { %v477_v14 = vpack.c.bf16 %v474_v12, %v473_v11 }
 0x303   :  { %777 = vmatprep.mubr.bf16.mxu1 %v477_v14 }
 0x304   :  { %778 = vmatmul.mubr.bf16.vlgmr.msra.gmra.mrb[4].mxu1 %v478_v13 }
 0x3d7   :  { %v779_v16 = vpop.f32.mrb[4].mxu1 }
 0x3d8   :  { %v593_v17 = vadd.f32 %v779_v16, %v652_v15  ;;  %v584_v18 = vpop.f32.mrb[5].mxu1 }
 0x3d9   :  { %v585_v19 = vadd.f32 %v652_v15, %v584_v18  ;;  %v780_v20 = vpop.f32.mrb[6].mxu1 }
 0x3da   :  { %601 = vst [vmem:[#allocation10 + $0x10] sm:$0xff] %v593_v17  ;;  %v596_v21 = vadd.f32 %v780_v20, %v652_v15  ;;  %v587_v22 = vpop.f32.mrb[7].mxu1 }
 0x3db   :  { %599 = vst [vmem:[#allocation10] sm:$0xff] %v585_v19  ;;  %v588_v23 = vadd.f32 %v652_v15, %v587_v22 }
 0x3dc   :  { %602 = vst [vmem:[#allocation10 + $0x18] sm:$0xff] %v596_v21 }
 0x3dd   :  { %600 = vst [vmem:[#allocation10 + $0x8] sm:$0xff] %v588_v23 }
 0x3de   :  { %923 = shalt.err (!%p920_p8)
}
 0x3df   :  { %s924_s11 = scalar_lea.hbm %s1096_s7, 512 }
 0x3e0   :  { %p925_p9 = scmp.ne.s32.totalorder %s1096_s7, %s924_s11  ;;  %p928_p10 = scmp.lt.u32.totalorder %s924_s11, %s1096_s7 }
 0x3e2   :  { %p930_p11 = pnand %p928_p10, %p925_p9 }
 0x3e4   :  { %933 = shalt.err (!%p930_p11)
}
 0x3e5   :  { %s949_s27 = smov 128   ;;  %s950_s17 = smov 8  }
 0x3e6   :  { %614 = dma.vmem_to_hbm [thread:$0]  %s609_s8, 512, %s1096_s7, [#allocation4], %s949_s27, %s949_s27, %s950_s17  }
 0x3e7   :  { %940 = dma.done.wait [#allocation4], 512  }
 0x3e8   :  { %941 = vsyncadd [#allocation4], 4294966784 }
 0x3e9   :  { %618 = vsyncpa [#allocation3], 1 }
 0x3ea   :  { %619 = vsyncpa [#allocation6], 1 }
 0x3eb   :  { %620 = vsyncpa [#allocation9], 1 }
 0x3ec   :  { %621 = vsyncpa [#allocation4], 1 }

// kernel: tpu_custom_call.1
= control target key start
LH: loop header
LB: loop body
LE: loop exit
PB: predicated region body
PF: predicated region fallthrough
CT: control target
= control target key end

     0   :  { %12 = vsyncpa [#allocation3], 0  ;;  %s1089_s0 = inlined_call_operand.hbm [shape: bf16[32,128], index: 0, kind: input, shape index: {}]   ;;  %s1090_s1 = inlined_call_operand.hbm [shape: bf16[128,128], index: 1, kind: input, shape index: {}]   ;;  %s1091_s2 = inlined_call_operand.vmem [shape: f32[1,128], index: 2, kind: input, shape index: {}]   ;;  %s1092_s3 = inlined_call_operand.hbm [shape: bf16[2,128,128], index: 3, kind: input, shape index: {}]   ;;  %s1093_s4 = inlined_call_operand.vmem [shape: f32[2,1,128], index: 4, kind: input, shape index: {}]   ;;  %s1094_s5 = inlined_call_operand.hbm [shape: bf16[128,128], index: 5, kind: input, shape index: {}]   ;;  %s1095_s6 = inlined_call_operand.vmem [shape: f32[1,128], index: 6, kind: input, shape index: {}]   ;;  %s1096_s7 = inlined_call_operand.hbm [shape: f32[32,128], index: 7, kind: output, shape index: {}]  }
   0x1   :  { %13 = vsyncpa [#allocation6], 0 }
   0x2   :  { %14 = vsyncpa [#allocation9], 0 }
   0x3   :  { %15 = vsyncpa [#allocation4], 0  ;;  %s942_s24 = smov [#allocation5]   ;;  %s943_s26 = smov [#allocation2]  }
   0x4   :  { %s33_s25 = sshll.u32 %s942_s24, 4  ;;  %s21_s27 = sshll.u32 %s943_s26, 4  ;;  %s34_s25 = int_to_ptr.vmem [resolvable:$true] %s33_s25  ;;  %s991_s27 = int_to_ptr.vmem [resolvable:$true] %s21_s27 }
   0x5   :  { %s824_s30 = scalar_lea.hbm %s1090_s1, 1024 }
   0x6   :  { %p825_p0 = scmp.ne.s32.totalorder %s1090_s1, %s824_s30  ;;  %p828_p1 = scmp.lt.u32.totalorder %s824_s30, %s1090_s1 }
   0x8   :  { %p830_p2 = pnand %p828_p1, %p825_p0 }
   0xa   :  { %833 = shalt.err (!%p830_p2)
}
   0xb   :  { %s834_s12 = scalar_lea.vmem %s34_s25, 1024  ;;  %p839_p4 = scmp.lt.s32.totalorder %s34_s25, %s34_s25 }
   0xc   :  { %p835_p3 = scmp.ne.s32.totalorder %s34_s25, %s834_s12  ;;  %p840_p5 = scmp.lt.s32.totalorder %s834_s12, %s834_s12 }
   0xe   :  { %p841_p6 = por %p840_p5, %p839_p4 }
  0x10   :  { %p842_p7 = pnand %p841_p6, %p835_p3 }
  0x12   :  { %845 = shalt.err (!%p842_p7)
}
  0x13   :  { %s944_s13 = smov 64   ;;  %s945_s14 = smov 4  }
  0x14   :  { %39 = dma.hbm_to_vmem [thread:$0]  %s1090_s1, 1024, %s34_s25, [#allocation6], %s944_s13, %s944_s13, %s945_s14  }
  0x15   :  { %s846_s19 = scalar_lea.hbm %s1089_s0, 256 }
  0x16   :  { %p847_p8 = scmp.ne.s32.totalorder %s1089_s0, %s846_s19  ;;  %p850_p9 = scmp.lt.u32.totalorder %s846_s19, %s1089_s0 }
  0x18   :  { %p852_p10 = pnand %p850_p9, %p847_p8 }
  0x1a   :  { %855 = shalt.err (!%p852_p10)
}
  0x1b   :  { %s856_s24 = scalar_lea.vmem %s991_s27, 256  ;;  %p861_p12 = scmp.lt.s32.totalorder %s991_s27, %s991_s27 }
  0x1c   :  { %p857_p11 = scmp.ne.s32.totalorder %s991_s27, %s856_s24  ;;  %p862_p13 = scmp.lt.s32.totalorder %s856_s24, %s856_s24 }
  0x1e   :  { %p863_p0 = por %p862_p13, %p861_p12 }
  0x20   :  { %p864_p1 = pnand %p863_p0, %p857_p11 }
  0x22   :  { %867 = shalt.err (!%p864_p1)
}
  0x23   :  { %27 = dma.hbm_to_vmem [thread:$0]  %s1089_s0, 256, %s991_s27, [#allocation3], %s944_s13, %s944_s13, %s945_s14  }
  0x24   :  { %s946_s26 = smov [#allocation7]   ;;  %s947_s29 = smov [#allocation8]  }
  0x25   :  { %s47_s28 = sshll.u32 %s946_s26, 4  ;;  %s61_s30 = sshll.u32 %s947_s29, 4  ;;  %s48_s28 = int_to_ptr.vmem [resolvable:$true] %s47_s28  ;;  %s1028_s30 = int_to_ptr.vmem [resolvable:$true] %s61_s30 }
  0x26   :  { %s868_s10 = scalar_lea.hbm %s1092_s3, 2048 }
  0x27   :  { %p869_p2 = scmp.ne.s32.totalorder %s1092_s3, %s868_s10  ;;  %p872_p3 = scmp.lt.u32.totalorder %s868_s10, %s1092_s3 }
  0x29   :  { %p874_p4 = pnand %p872_p3, %p869_p2 }
  0x2b   :  { %877 = shalt.err (!%p874_p4)
}
  0x2c   :  { %s878_s0 = scalar_lea.vmem %s48_s28, 2048  ;;  %p883_p6 = scmp.lt.s32.totalorder %s48_s28, %s48_s28 }
  0x2d   :  { %p879_p5 = scmp.ne.s32.totalorder %s48_s28, %s878_s0  ;;  %p884_p7 = scmp.lt.s32.totalorder %s878_s0, %s878_s0 }
  0x2f   :  { %p885_p8 = por %p884_p7, %p883_p6 }
  0x31   :  { %p886_p9 = pnand %p885_p8, %p879_p5 }
  0x33   :  { %889 = shalt.err (!%p886_p9)
}
  0x34   :  { %53 = dma.hbm_to_vmem [thread:$0]  %s1092_s3, 2048, %s48_s28, [#allocation6], %s944_s13, %s944_s13, %s945_s14  }
  0x35   :  { %s890_s20 = scalar_lea.hbm %s1094_s5, 1024 }
  0x36   :  { %p891_p10 = scmp.ne.s32.totalorder %s1094_s5, %s890_s20  ;;  %p894_p11 = scmp.lt.u32.totalorder %s890_s20, %s1094_s5 }
  0x38   :  { %p896_p12 = pnand %p894_p11, %p891_p10 }
  0x3a   :  { %899 = shalt.err (!%p896_p12)
}
  0x3b   :  { %s900_s1 = scalar_lea.vmem %s1028_s30, 1024  ;;  %p905_p0 = scmp.lt.s32.totalorder %s1028_s30, %s1028_s30 }
  0x3c   :  { %p901_p13 = scmp.ne.s32.totalorder %s1028_s30, %s900_s1  ;;  %p906_p1 = scmp.lt.s32.totalorder %s900_s1, %s900_s1 }
  0x3e   :  { %p907_p2 = por %p906_p1, %p905_p0 }
  0x40   :  { %p908_p3 = pnand %p907_p2, %p901_p13 }
  0x42   :  { %911 = shalt.err (!%p908_p3)
}
  0x43   :  { %67 = dma.hbm_to_vmem [thread:$0]  %s1094_s5, 1024, %s1028_s30, [#allocation9], %s944_s13, %s944_s13, %s945_s14  }
  0x44   :  { %934 = dma.done.wait [#allocation3], 256  }
  0x45   :  { %935 = vsyncadd [#allocation3], 4294967040 }
  0x46   :  { %936 = dma.done.wait [#allocation6], 3072  }
  0x47   :  { %937 = vsyncadd [#allocation6], 4294964224 }
  0x48   :  { %938 = dma.done.wait [#allocation9], 1024  }
  0x49   :  { %939 = vsyncadd [#allocation9], 4294966272  ;;  %v790_v0 = vld [vmem:[#allocation5] sm:$0xff]   ;;  %v791_v1 = vld [vmem:[#allocation5 + $0x8] sm:$0xff]  }
  0x4a   :  { %701 = vmatprep.subr.bf16.mxu0 %v790_v0  ;;  %v792_v2 = vld [vmem:[#allocation5 + $0x10] sm:$0xff]   ;;  %v793_v3 = vld [vmem:[#allocation5 + $0x18] sm:$0xff]   ;;  %v800_v5 = vld [vmem:[#allocation7] sm:$0xff]  }
  0x4b   :  { %702 = vmatpush3.bf16.msra.mxu0 %v790_v0  ;;  %v798_v4 = vld [vmem:[#allocation2] sm:$0xff]   ;;  %v801_v6 = vld [vmem:[#allocation7 + $0x8] sm:$0xff]   ;;  %v794_v7 = vld [vmem:[#allocation5 + $0x20] sm:$0xff]   ;;  %721 = vmatprep.subr.bf16.mxu1 %v800_v5 }
  0x4c   :  { %703 = vmatprep.subr.bf16.mxu0 %v791_v1  ;;  %717 = vmatprep.mubr.bf16.mxu0 %v798_v4  ;;  %v802_v8 = vld [vmem:[#allocation7 + $0x10] sm:$0xff]   ;;  %v795_v9 = vld [vmem:[#allocation5 + $0x28] sm:$0xff]   ;;  %v803_v10 = vld [vmem:[#allocation7 + $0x18] sm:$0xff]  }
  0x4d   :  { %722 = vmatpush3.bf16.msra.mxu1 %v800_v5  ;;  %v796_v11 = vld [vmem:[#allocation5 + $0x30] sm:$0xff]   ;;  %v804_v12 = vld [vmem:[#allocation7 + $0x20] sm:$0xff]   ;;  %v797_v13 = vld [vmem:[#allocation5 + $0x38] sm:$0xff]  }
  0x4e   :  { %723 = vmatprep.subr.bf16.mxu1 %v801_v6  ;;  %v805_v14 = vld [vmem:[#allocation7 + $0x28] sm:$0xff]   ;;  %v799_v15 = vld [vmem:[#allocation2 + $0x8] sm:$0xff]   ;;  %v806_v16 = vld [vmem:[#allocation7 + $0x30] sm:$0xff]  }
  0x4f   :  { %704 = vmatpush3.bf16.msra.mxu0 %v791_v1  ;;  %v807_v17 = vld [vmem:[#allocation7 + $0x38] sm:$0xff]   ;;  %v808_v18 = vld [vmem:[#allocation7 + $0x40] sm:$0xff]   ;;  %v809_v19 = vld [vmem:[#allocation7 + $0x48] sm:$0xff]  }
  0x50   :  { %705 = vmatprep.subr.bf16.mxu0 %v792_v2  ;;  %v810_v20 = vld [vmem:[#allocation7 + $0x50] sm:$0xff]   ;;  %v811_v21 = vld [vmem:[#allocation7 + $0x58] sm:$0xff]   ;;  %v812_v22 = vld [vmem:[#allocation7 + $0x60] sm:$0xff]  }
  0x51   :  { %724 = vmatpush3.bf16.msra.mxu1 %v801_v6  ;;  %v813_v23 = vld [vmem:[#allocation7 + $0x68] sm:$0xff]   ;;  %v622_v24 = vld [vmem:[%s1091_s2] ss:$0 sm:$0xff]  ;;  %v815_v40 = vld [vmem:[#allocation7 + $0x78] sm:$0xff]  }
  0x52   :  { %725 = vmatprep.subr.bf16.mxu1 %v802_v8  ;;  %v814_v39 = vld [vmem:[#allocation7 + $0x70] sm:$0xff]   ;;  %v816_v41 = vld [vmem:[#allocation8] sm:$0xff]   ;;  %v817_v42 = vld [vmem:[#allocation8 + $0x8] sm:$0xff]  }
  0x53   :  { %706 = vmatpush3.bf16.msra.mxu0 %v792_v2  ;;  %v818_v43 = vld [vmem:[#allocation8 + $0x10] sm:$0xff]   ;;  %v819_v44 = vld [vmem:[#allocation8 + $0x18] sm:$0xff]   ;;  %v820_v45 = vld [vmem:[#allocation8 + $0x20] sm:$0xff]  }
  0x54   :  { %707 = vmatprep.subr.bf16.mxu0 %v793_v3  ;;  %v821_v46 = vld [vmem:[#allocation8 + $0x28] sm:$0xff]   ;;  %v633_v47 = vld [vmem:[%s1093_s4] ss:$0 sm:$0xff]  ;;  %v823_v63 = vld [vmem:[#allocation8 + $0x38] sm:$0xff]  }
  0x55   :  { %726 = vmatpush3.bf16.msra.mxu1 %v802_v8  ;;  %v822_v62 = vld [vmem:[#allocation8 + $0x30] sm:$0xff]  }
  0x56   :  { %727 = vmatprep.subr.bf16.mxu1 %v803_v10  ;;  %v643_v0 = vld [vmem:[%s1093_s4 + $0x1] ss:$0 sm:$0xff]  ;;  %s948_s4 = smov [#allocation10]  }
  0x57   :  { %708 = vmatpush3.bf16.msra.mxu0 %v793_v3  ;;  %s608_s8 = sshll.u32 %s948_s4, 4  ;;  %s609_s8 = int_to_ptr.vmem [resolvable:$true] %s608_s8 }
  0x58   :  { %709 = vmatprep.subr.bf16.mxu0 %v794_v7  ;;  %s912_s9 = scalar_lea.vmem %s609_s8, 512  ;;  %p917_p5 = scmp.lt.s32.totalorder %s609_s8, %s609_s8 }
  0x59   :  { %728 = vmatpush3.bf16.msra.mxu1 %v803_v10  ;;  %p913_p4 = scmp.ne.s32.totalorder %s609_s8, %s912_s9  ;;  %p918_p6 = scmp.lt.s32.totalorder %s912_s9, %s912_s9 }
  0x5a   :  { %729 = vmatprep.subr.bf16.mxu1 %v804_v12 }
  0x5b   :  { %710 = vmatpush3.bf16.msra.mxu0 %v794_v7  ;;  %p919_p7 = por %p918_p6, %p917_p5 }
  0x5c   :  { %711 = vmatprep.subr.bf16.mxu0 %v795_v9 }
  0x5d   :  { %730 = vmatpush3.bf16.msra.mxu1 %v804_v12  ;;  %p920_p8 = pnand %p919_p7, %p913_p4 }
  0x5e   :  { %731 = vmatprep.subr.bf16.mxu1 %v805_v14 }
  0x5f   :  { %712 = vmatpush3.bf16.msra.mxu0 %v795_v9 }
  0x60   :  { %713 = vmatprep.subr.bf16.mxu0 %v796_v11 }
  0x61   :  { %732 = vmatpush3.bf16.msra.mxu1 %v805_v14 }
  0x62   :  { %733 = vmatprep.subr.bf16.mxu1 %v806_v16 }
  0x63   :  { %714 = vmatpush3.bf16.msra.mxu0 %v796_v11 }
  0x64   :  { %715 = vmatprep.subr.bf16.mxu0 %v797_v13 }
  0x65   :  { %734 = vmatpush3.bf16.msra.mxu1 %v806_v16 }
  0x66   :  { %735 = vmatprep.subr.bf16.mxu1 %v807_v17 }
  0x67   :  { %716 = vmatpush3.bf16.msra.mxu0 %v797_v13 }
  0x68   :  { %741 = vmatprep.subr.bf16.mxu0 %v808_v18 }
  0x69   :  { %736 = vmatpush3.bf16.msra.mxu1 %v807_v17 }
  0x6a   :  { %718 = vmatmul.mubr.bf16.vlgmr.msra.gmra.mrb[0].mxu0 %v799_v15  ;;  %761 = vmatprep.subr.bf16.mxu1 %v816_v41  ;;  %v652_v15 = vld [vmem:[%s1095_s6] ss:$0 sm:$0xff] }
  0x6b   :  { %742 = vmatpush3.bf16.msra.mxu0 %v808_v18 }
  0x6c   :  { %743 = vmatprep.subr.bf16.mxu0 %v809_v19 }
  0x6f   :  { %744 = vmatpush3.bf16.msra.mxu0 %v809_v19 }
  0x70   :  { %745 = vmatprep.subr.bf16.mxu0 %v810_v20 }
  0x73   :  { %746 = vmatpush3.bf16.msra.mxu0 %v810_v20 }
  0x74   :  { %747 = vmatprep.subr.bf16.mxu0 %v811_v21 }
  0x77   :  { %748 = vmatpush3.bf16.msra.mxu0 %v811_v21 }
  0x78   :  { %749 = vmatprep.subr.bf16.mxu0 %v812_v22 }
  0x7b   :  { %750 = vmatpush3.bf16.msra.mxu0 %v812_v22 }
  0x7c   :  { %751 = vmatprep.subr.bf16.mxu0 %v813_v23 }
  0x7f   :  { %752 = vmatpush3.bf16.msra.mxu0 %v813_v23 }
  0x80   :  { %753 = vmatprep.subr.bf16.mxu0 %v814_v39 }
  0x83   :  { %754 = vmatpush3.bf16.msra.mxu0 %v814_v39 }
  0x84   :  { %755 = vmatprep.subr.bf16.mxu0 %v815_v40 }
  0x87   :  { %756 = vmatpush3.bf16.msra.mxu0 %v815_v40 }
 0x13d   :  { %v719_v25 = vpop.f32.mrb[0].mxu0 }
 0x13e   :  { %v213_v26 = vadd.f32 %v719_v25, %v622_v24  ;;  %v204_v27 = vpop.f32.mrb[1].mxu0 }
 0x13f   :  { %v205_v28 = vadd.f32 %v622_v24, %v204_v27  ;;  %v720_v29 = vpop.f32.mrb[2].mxu0 }
 0x140   :  { %v216_v30 = vadd.f32 %v720_v29, %v622_v24  ;;  %v207_v31 = vpop.f32.mrb[3].mxu0  ;;  %v221_v33 = vmax.f32 %v213_v26, 0.0 }
 0x141   :  { %v208_v32 = vadd.f32 %v622_v24, %v207_v31  ;;  %v219_v35 = vmax.f32 %v205_v28, 0.0 }
 0x142   :  { %v222_v34 = vmax.f32 %v216_v30, 0.0 }
 0x143   :  { %v220_v36 = vmax.f32 %v208_v32, 0.0 }
 0x144   :  { %v224_v37 = vpack.c.bf16 %v222_v34, %v221_v33 }
 0x145   :  { %v223_v38 = vpack.c.bf16 %v220_v36, %v219_v35 }
 0x147   :  { %737 = vmatprep.mubr.bf16.mxu1 %v223_v38 }
 0x148   :  { %738 = vmatmul.mubr.bf16.vlgmr.msra.gmra.mrb[0].mxu1 %v224_v37 }
 0x149   :  { %762 = vmatpush3.bf16.msra.mxu1 %v816_v41 }
 0x14a   :  { %763 = vmatprep.subr.bf16.mxu1 %v817_v42 }
 0x14d   :  { %764 = vmatpush3.bf16.msra.mxu1 %v817_v42 }
 0x14e   :  { %765 = vmatprep.subr.bf16.mxu1 %v818_v43 }
 0x151   :  { %766 = vmatpush3.bf16.msra.mxu1 %v818_v43 }
 0x152   :  { %767 = vmatprep.subr.bf16.mxu1 %v819_v44 }
 0x155   :  { %768 = vmatpush3.bf16.msra.mxu1 %v819_v44 }
 0x156   :  { %769 = vmatprep.subr.bf16.mxu1 %v820_v45 }
 0x159   :  { %770 = vmatpush3.bf16.msra.mxu1 %v820_v45 }
 0x15a   :  { %771 = vmatprep.subr.bf16.mxu1 %v821_v46 }
 0x15d   :  { %772 = vmatpush3.bf16.msra.mxu1 %v821_v46 }
 0x15e   :  { %773 = vmatprep.subr.bf16.mxu1 %v822_v62 }
 0x161   :  { %774 = vmatpush3.bf16.msra.mxu1 %v822_v62 }
 0x162   :  { %775 = vmatprep.subr.bf16.mxu1 %v823_v63 }
 0x165   :  { %776 = vmatpush3.bf16.msra.mxu1 %v823_v63 }
 0x21b   :  { %v739_v48 = vpop.f32.mrb[0].mxu1 }
 0x21c   :  { %v339_v49 = vadd.f32 %v739_v48, %v633_v47  ;;  %v330_v50 = vpop.f32.mrb[1].mxu1 }
 0x21d   :  { %v331_v51 = vadd.f32 %v633_v47, %v330_v50  ;;  %v740_v52 = vpop.f32.mrb[2].mxu1 }
 0x21e   :  { %v342_v53 = vadd.f32 %v740_v52, %v633_v47  ;;  %v333_v54 = vpop.f32.mrb[3].mxu1  ;;  %v347_v56 = vmax.f32 %v339_v49, 0.0 }
 0x21f   :  { %v334_v55 = vadd.f32 %v633_v47, %v333_v54  ;;  %v345_v58 = vmax.f32 %v331_v51, 0.0 }
 0x220   :  { %v348_v57 = vmax.f32 %v342_v53, 0.0 }
 0x221   :  { %v346_v59 = vmax.f32 %v334_v55, 0.0 }
 0x222   :  { %v350_v60 = vpack.c.bf16 %v348_v57, %v347_v56 }
 0x223   :  { %v349_v61 = vpack.c.bf16 %v346_v59, %v345_v58 }
 0x225   :  { %757 = vmatprep.mubr.bf16.mxu0 %v349_v61 }
 0x226   :  { %758 = vmatmul.mubr.bf16.vlgmr.msra.gmra.mrb[4].mxu0 %v350_v60 }
 0x2f9   :  { %v759_v1 = vpop.f32.mrb[4].mxu0 }
 0x2fa   :  { %v467_v2 = vadd.f32 %v759_v1, %v643_v0  ;;  %v458_v3 = vpop.f32.mrb[5].mxu0 }
 0x2fb   :  { %v459_v4 = vadd.f32 %v643_v0, %v458_v3  ;;  %v760_v5 = vpop.f32.mrb[6].mxu0 }
 0x2fc   :  { %v470_v6 = vadd.f32 %v760_v5, %v643_v0  ;;  %v461_v7 = vpop.f32.mrb[7].mxu0  ;;  %v475_v9 = vmax.f32 %v467_v2, 0.0 }
 0x2fd   :  { %v462_v8 = vadd.f32 %v643_v0, %v461_v7  ;;  %v473_v11 = vmax.f32 %v459_v4, 0.0 }
 0x2fe   :  { %v476_v10 = vmax.f32 %v470_v6, 0.0 }
 0x2ff   :  { %v474_v12 = vmax.f32 %v462_v8, 0.0 }
 0x300   :  { %v478_v13 = vpack.c.bf16 %v476_v10, %v475_v9 }
 0x301   :  { %v477_v14 = vpack.c.bf16 %v474_v12, %v473_v11 }
 0x303   :  { %777 = vmatprep.mubr.bf16.mxu1 %v477_v14 }
 0x304   :  { %778 = vmatmul.mubr.bf16.vlgmr.msra.gmra.mrb[4].mxu1 %v478_v13 }
 0x3d7   :  { %v779_v16 = vpop.f32.mrb[4].mxu1 }
 0x3d8   :  { %v593_v17 = vadd.f32 %v779_v16, %v652_v15  ;;  %v584_v18 = vpop.f32.mrb[5].mxu1 }
 0x3d9   :  { %v585_v19 = vadd.f32 %v652_v15, %v584_v18  ;;  %v780_v20 = vpop.f32.mrb[6].mxu1 }
 0x3da   :  { %601 = vst [vmem:[#allocation10 + $0x10] sm:$0xff] %v593_v17  ;;  %v596_v21 = vadd.f32 %v780_v20, %v652_v15  ;;  %v587_v22 = vpop.f32.mrb[7].mxu1 }
 0x3db   :  { %599 = vst [vmem:[#allocation10] sm:$0xff] %v585_v19  ;;  %v588_v23 = vadd.f32 %v652_v15, %v587_v22 }
 0x3dc   :  { %602 = vst [vmem:[#allocation10 + $0x18] sm:$0xff] %v596_v21 }
 0x3dd   :  { %600 = vst [vmem:[#allocation10 + $0x8] sm:$0xff] %v588_v23 }
 0x3de   :  { %923 = shalt.err (!%p920_p8)
}
 0x3df   :  { %s924_s11 = scalar_lea.hbm %s1096_s7, 512 }
 0x3e0   :  { %p925_p9 = scmp.ne.s32.totalorder %s1096_s7, %s924_s11  ;;  %p928_p10 = scmp.lt.u32.totalorder %s924_s11, %s1096_s7 }
 0x3e2   :  { %p930_p11 = pnand %p928_p10, %p925_p9 }
 0x3e4   :  { %933 = shalt.err (!%p930_p11)
}
 0x3e5   :  { %s949_s27 = smov 128   ;;  %s950_s17 = smov 8  }
 0x3e6   :  { %614 = dma.vmem_to_hbm [thread:$0]  %s609_s8, 512, %s1096_s7, [#allocation4], %s949_s27, %s949_s27, %s950_s17  }
 0x3e7   :  { %940 = dma.done.wait [#allocation4], 512  }
 0x3e8   :  { %941 = vsyncadd [#allocation4], 4294966784 }
 0x3e9   :  { %618 = vsyncpa [#allocation3], 1 }
 0x3ea   :  { %619 = vsyncpa [#allocation6], 1 }
 0x3eb   :  { %620 = vsyncpa [#allocation9], 1 }
 0x3ec   :  { %621 = vsyncpa [#allocation4], 1 }

</bundles_post_ra>
